<compile_context>
chip_gen: v5e
topology: v5e:2x2
jax: 0.10.0
libtpu: 0.0.40
codegen_flags: <defaults>
</compile_context>

<pallas_src>
import jax
import jax.numpy as jnp
from jax.experimental import pallas as pl
from jax.experimental.pallas import tpu as pltpu

CHUNK = 512      # lanes per inner-loop chunk (bounds vreg working set ~<50 vregs)
TB_MAX = 16384   # batch columns per grid step; sweep 8192-32768 (cap lower on v7x if needed)


def _round_up(a, m):
    return ((a + m - 1) // m) * m


def paddlenet_kernel(x_ref, w_ref, o_ref):
    # x_ref: (cpt, 6, CHUNK)  -- per-chunk [features+ones] x batch, batch on lanes
    # w_ref: (32, 32)         -- packed params, resident in VMEM across all grid steps
    # o_ref: (cpt, 1, CHUNK)  -- lane-dense output
    cpt = x_ref.shape[0]
    cw = x_ref.shape[2]
    f32 = jnp.float32

    w = w_ref[...]                      # tiny; loaded once per grid step
    w1b = w[0:24, 0:6]                  # [W1 | b1]  (24, 6)   bias folded into MXU
    w2 = w[0:24, 6:30]                  # (24, 24)
    w3 = w[24:25, 6:30]                 # (1, 24)
    b2 = w[0:24, 30:31].astype(f32)     # (24, 1)
    b3 = w[24:25, 30:31].astype(f32)    # (1, 1)
    # Hoist the (24,1) -> (24,cw) lane broadcast out of the chunk loop (per review).
    b2b = jnp.broadcast_to(b2, (24, cw))

    @pl.loop(0, cpt)
    def _(c):
        xc = x_ref[c]                                                       # (6, cw)
        h1 = jnp.dot(w1b, xc, preferred_element_type=f32)                   # bias rides MXU
        h1 = jnp.maximum(h1, 0.0)                                           # (24, cw) relu
        h2 = jnp.dot(w2, h1.astype(w2.dtype), preferred_element_type=f32) + b2b
        h2 = jnp.maximum(h2, 0.0)                                           # (24, cw) relu
        h3 = jnp.dot(w3, h2.astype(w3.dtype), preferred_element_type=f32) + b3
        o_ref[c] = jnp.tanh(h3).astype(o_ref.dtype)                         # (1, cw)


def paddlenet_forward(x, params, *, tb_max=TB_MAX, io_dtype=jnp.float32):
    """x: (B, 5) float32 (PyTorch nn.Linear layout). Returns (B, 1) float32."""
    w1, b1, w2, b2, w3, b3 = params
    B = x.shape[0]
    assert x.shape[1] == 5

    # Choose the batch tile: as large as tb_max, but never (much) larger than B.
    # For very large B this naturally yields many tiles so the "parallel" batch axis
    # load-balances across v7x's 2 TensorCores.
    tb = min(_round_up(max(tb_max, CHUNK), CHUNK), _round_up(max(B, 1), CHUNK))
    Bp = _round_up(B, tb)
    num_tiles = Bp // tb
    cpt = tb // CHUNK          # chunks per grid step (inner loop trip count)
    T = Bp // CHUNK            # total chunks

    # Single fused pad pass: pad batch rows (values irrelevant, sliced off below) and
    # append a ones feature column so fc1's bias is folded into the matmul (K=5 -> 6).
    x_aug = jnp.pad(x.astype(io_dtype), ((0, Bp - B), (0, 1)), constant_values=1.0)  # (Bp, 6)
    # (Bp,6)->(T,CHUNK,6) is a free reshape; the transpose to (T,6,CHUNK) is the one
    # layout pass that puts batch on the lane axis.
    xt = x_aug.reshape(T, CHUNK, 6).transpose(0, 2, 1)                               # (T, 6, CHUNK)

    # Pack all six parameters into one resident (32,32) block:
    #   [0:24, 0:5]=W1  [0:24, 5:6]=b1  [0:24, 6:30]=W2  [24:25, 6:30]=W3
    #   [0:24, 30:31]=b2  [24:25, 30:31]=b3
    pack = jnp.zeros((32, 32), jnp.float32)
    pack = pack.at[0:24, 0:5].set(w1)
    pack = pack.at[0:24, 5:6].set(b1)
    pack = pack.at[0:24, 6:30].set(w2)
    pack = pack.at[24:25, 6:30].set(w3)
    pack = pack.at[0:24, 30:31].set(b2)
    pack = pack.at[24:25, 30:31].set(b3)
    pack = pack.astype(io_dtype)

    itemsize = jnp.dtype(io_dtype).itemsize
    flops = 2 * Bp * (6 * 24 + 24 * 24 + 24 * 1)
    bytes_accessed = Bp * 6 * itemsize + Bp * 1 * 4 + 32 * 32 * itemsize

    out3 = pl.pallas_call(
        paddlenet_kernel,
        out_shape=jax.ShapeDtypeStruct((T, 1, CHUNK), jnp.float32),
        grid=(num_tiles,),
        in_specs=[
            pl.BlockSpec((cpt, 6, CHUNK), lambda i: (i, 0, 0)),   # batch tile
            pl.BlockSpec((32, 32), lambda i: (0, 0)),             # resident packed weights
        ],
        out_specs=pl.BlockSpec((cpt, 1, CHUNK), lambda i: (i, 0, 0)),
        compiler_params=pltpu.CompilerParams(
            dimension_semantics=("parallel",),
            vmem_limit_bytes=32 * 1024 * 1024,
        ),
        cost_estimate=pl.CostEstimate(
            flops=flops, transcendentals=Bp, bytes_accessed=bytes_accessed),
    )(xt, pack)

    return out3.reshape(Bp, 1)[:B]  # back to (B, 1) PyTorch layout


def init_params(key):
    """torch.nn.Linear-style U[-1/sqrt(fan_in), 1/sqrt(fan_in)] init; weights (out,in), biases (out,1)."""
    def linear(key, fan_in, fan_out):
        kw, kb = jax.random.split(key)
        bound = 1.0 / jnp.sqrt(float(fan_in))
        w = jax.random.uniform(kw, (fan_out, fan_in), jnp.float32, -bound, bound)
        b = jax.random.uniform(kb, (fan_out, 1), jnp.float32, -bound, bound)
        return w, b

    k1, k2, k3 = jax.random.split(key, 3)
    w1, b1 = linear(k1, 5, 24)
    w2, b2 = linear(k2, 24, 24)
    w3, b3 = linear(k3, 24, 1)
    return (w1, b1, w2, b2, w3, b3)


def reference_forward(x, params):
    """Pure-JAX reference with the same math as the kernel."""
    w1, b1, w2, b2, w3, b3 = params
    xt = x.T                                              # (5, B)
    h1 = jnp.maximum(w1 @ xt + b1, 0.0)                   # (24, B)
    h2 = jnp.maximum(w2 @ h1 + b2, 0.0)                   # (24, B)
    return jnp.tanh(w3 @ h2 + b3).T                       # (B, 1)


if __name__ == "__main__":
    key = jax.random.PRNGKey(0)
    kx, kp = jax.random.split(key)
    params = init_params(kp)

    # Small primary check (f32, single tile, single chunk).
    x_small = jax.random.normal(kx, (8, 5), jnp.float32)
    out = jax.block_until_ready(paddlenet_forward(x_small, params))
    ref = reference_forward(x_small, params)
    assert out.shape == (8, 1)
    assert jnp.allclose(out, ref, atol=1e-4, rtol=1e-4)

    # Multi-chunk inner loop (cpt > 1) + batch padding.
    x_med = jax.random.normal(jax.random.PRNGKey(1), (700, 5), jnp.float32)
    out_m = jax.block_until_ready(paddlenet_forward(x_med, params))
    assert jnp.allclose(out_m, reference_forward(x_med, params), atol=1e-4, rtol=1e-4)

    # Multiple grid tiles (exercise the parallel batch grid axis).
    x_big = jax.random.normal(jax.random.PRNGKey(2), (1200, 5), jnp.float32)
    out_b = jax.block_until_ready(paddlenet_forward(x_big, params, tb_max=512))
    assert jnp.allclose(out_b, reference_forward(x_big, params), atol=1e-4, rtol=1e-4)

    # bf16 I/O path (f32 accumulation) — halves HBM traffic / VMEM on v6e/v7x.
    out_h = jax.block_until_ready(paddlenet_forward(x_med, params, io_dtype=jnp.bfloat16))
    assert jnp.allclose(out_h, reference_forward(x_med, params), atol=1e-1, rtol=1e-1)

    print("KERNEL_OK")
</pallas_src>

<mosaic_0001>
module attributes {stable_mosaic.version = 11 : i64} {
  func.func @paddlenet_kernel(%arg0: i32, %arg1: memref<1x6x512xf32, #tpu.memory_space<vmem>>, %arg2: memref<32x32xf32, #tpu.memory_space<vmem>>, %arg3: memref<1x1x512xf32, #tpu.memory_space<vmem>>) attributes {dimension_semantics = [#tpu.dimension_semantics<parallel>], iteration_bounds = array<i64: 1>, scalar_prefetch = 0 : i64, scratch_operands = 0 : i64, tpu.core_type = #tpu.core_type<tc>, window_params = [{transform_indices = @transform_0, window_bounds = array<i64: 1, 6, 512>}, {pipeline_mode = #tpu.pipeline_mode<synchronous>, transform_indices = @transform_1, window_bounds = array<i64: 32, 32>}, {transform_indices = @transform_2, window_bounds = array<i64: 1, 1, 512>}]} {
    %c0 = arith.constant 0 : index
    %c0_0 = arith.constant 0 : index
    %0 = vector.load %arg2[%c0, %c0_0] : memref<32x32xf32, #tpu.memory_space<vmem>>, vector<32x32xf32>
    %1 = vector.extract_strided_slice %0 {offsets = [0, 0], sizes = [24, 6], strides = [1, 1]} : vector<32x32xf32> to vector<24x6xf32>
    %2 = vector.extract_strided_slice %0 {offsets = [0, 6], sizes = [24, 24], strides = [1, 1]} : vector<32x32xf32> to vector<24x24xf32>
    %3 = vector.extract_strided_slice %0 {offsets = [24, 6], sizes = [1, 24], strides = [1, 1]} : vector<32x32xf32> to vector<1x24xf32>
    %4 = vector.extract_strided_slice %0 {offsets = [0, 30], sizes = [24, 1], strides = [1, 1]} : vector<32x32xf32> to vector<24x1xf32>
    %5 = vector.extract_strided_slice %0 {offsets = [24, 30], sizes = [1, 1], strides = [1, 1]} : vector<32x32xf32> to vector<1x1xf32>
    %6 = vector.shape_cast %4 : vector<24x1xf32> to vector<24x1xf32>
    %7 = vector.broadcast %6 : vector<24x1xf32> to vector<24x512xf32>
    %c0_i32 = arith.constant 0 : i32
    %c1_i32 = arith.constant 1 : i32
    %8 = arith.muli %c0_i32, %c1_i32 : i32
    %c0_i32_1 = arith.constant 0 : i32
    %9 = arith.addi %c0_i32_1, %8 : i32
    %10 = arith.index_cast %9 : i32 to index
    %c0_2 = arith.constant 0 : index
    %c0_3 = arith.constant 0 : index
    %11 = vector.load %arg1[%10, %c0_2, %c0_3] : memref<1x6x512xf32, #tpu.memory_space<vmem>>, vector<1x6x512xf32>
    %12 = vector.shape_cast %11 : vector<1x6x512xf32> to vector<6x512xf32>
    %cst = arith.constant dense<0.000000e+00> : vector<24x512xf32>
    %13 = tpu.matmul %1, %12, %cst {dimension_numbers = #tpu.dot_dimension_numbers<[1], [0], [0], [1], [0, 0, 1, 1], [], []>} : vector<24x6xf32>, vector<6x512xf32>, vector<24x512xf32> -> vector<24x512xf32>
    %cst_4 = arith.constant 0.000000e+00 : f32
    %14 = vector.broadcast %cst_4 : f32 to vector<24x512xf32>
    %15 = arith.maximumf %13, %14 : vector<24x512xf32>
    %cst_5 = arith.constant dense<0.000000e+00> : vector<24x512xf32>
    %16 = tpu.matmul %2, %15, %cst_5 {dimension_numbers = #tpu.dot_dimension_numbers<[1], [0], [0], [1], [0, 0, 1, 1], [], []>} : vector<24x24xf32>, vector<24x512xf32>, vector<24x512xf32> -> vector<24x512xf32>
    %17 = arith.addf %16, %7 : vector<24x512xf32>
    %cst_6 = arith.constant 0.000000e+00 : f32
    %18 = vector.broadcast %cst_6 : f32 to vector<24x512xf32>
    %19 = arith.maximumf %17, %18 : vector<24x512xf32>
    %cst_7 = arith.constant dense<0.000000e+00> : vector<1x512xf32>
    %20 = tpu.matmul %3, %19, %cst_7 {dimension_numbers = #tpu.dot_dimension_numbers<[1], [0], [0], [1], [0, 0, 1, 1], [], []>} : vector<1x24xf32>, vector<24x512xf32>, vector<1x512xf32> -> vector<1x512xf32>
    %21 = vector.broadcast %5 : vector<1x1xf32> to vector<1x512xf32>
    %22 = arith.addf %20, %21 : vector<1x512xf32>
    %23 = math.tanh %22 : vector<1x512xf32>
    %24 = arith.index_cast %9 : i32 to index
    %c0_8 = arith.constant 0 : index
    %c0_9 = arith.constant 0 : index
    %25 = vector.load %arg3[%24, %c0_8, %c0_9] : memref<1x1x512xf32, #tpu.memory_space<vmem>>, vector<1x1x512xf32>
    %26 = vector.shape_cast %25 : vector<1x1x512xf32> to vector<1x512xf32>
    %27 = vector.shape_cast %23 : vector<1x512xf32> to vector<1x1x512xf32>
    tpu.vector_store %arg3[%24, %c0_8, %c0_9], %27 {strides = array<i32>} : memref<1x1x512xf32, #tpu.memory_space<vmem>>, vector<1x1x512xf32>,
    %c1_i32_10 = arith.constant 1 : i32
    return
  }
  func.func @transform_0(%arg0: i32) -> (i32, i32, i32) {
    %c0_i32 = arith.constant 0 : i32
    %c0_i32_0 = arith.constant 0 : i32
    %c0_i32_1 = arith.constant 0 : i32
    return %arg0, %c0_i32, %c0_i32_0 : i32, i32, i32
  }
  func.func @transform_1(%arg0: i32) -> (i32, i32) {
    %c0_i32 = arith.constant 0 : i32
    %c0_i32_0 = arith.constant 0 : i32
    %c0_i32_1 = arith.constant 0 : i32
    return %c0_i32, %c0_i32_0 : i32, i32
  }
  func.func @transform_2(%arg0: i32) -> (i32, i32, i32) {
    %c0_i32 = arith.constant 0 : i32
    %c0_i32_0 = arith.constant 0 : i32
    %c0_i32_1 = arith.constant 0 : i32
    return %arg0, %c0_i32, %c0_i32_0 : i32, i32, i32
  }
}

</mosaic_0001>

<bundles_post_ra>
// kernel: tpu_custom_call.1
= control target key start
LH: loop header
LB: loop body
LE: loop exit
PB: predicated region body
PF: predicated region fallthrough
CT: control target
= control target key end

     0   :  { %vm42_vm0 = vcmask 1045504   ;;  %vm35_vm1 = vcmask 48128   ;;  %s585_s0 = inlined_call_operand.vmem [shape: f32[1,6,512], index: 0, kind: input, shape index: {}]   ;;  %s586_s1 = inlined_call_operand.vmem [shape: f32[32,32], index: 1, kind: input, shape index: {}]   ;;  %s587_s2 = inlined_call_operand.hbm [shape: f32[1,1,512], index: 2, kind: output, shape index: {}]  }
   0x1   :  { %v31_v0 = vld [vmem:[%s585_s0] sm:$0x3f]  ;;  %v32_v1 = vld [vmem:[%s585_s0 + $0x8] sm:$0x3f]  ;;  %v33_v3 = vld [vmem:[%s585_s0 + $0x10] sm:$0x3f] }
   0x2   :  { %v527_v2 = vld [vmem:[%s586_s1] sm:$0xff]  ;;  %428 = vmatpush.msk.msra.mxu0 %vm42_vm0, %v31_v0  ;;  %432 = vmatpush.msk.msra.mxu1 %vm42_vm0, %v32_v1  ;;  %v34_v4 = vld [vmem:[%s585_s0 + $0x18] sm:$0x3f] }
   0x3   :  { %436 = vmatpush.msk.msra.mxu2 %vm42_vm0, %v33_v3  ;;  %440 = vmatpush.msk.msra.mxu3 %vm42_vm0, %v34_v4 }
   0x4   :  { %7 = vsyncpa [#allocation3], 0  ;;  %429 = vmatmul.msk.f32.vlgmr.msra.gmra.mxu0 %vm35_vm1, %v527_v2  ;;  %433 = vmatmul.msk.f32.vlgmr.msra.gmra.mxu1 %vm35_vm1, %v527_v2  ;;  %v14_v5 = vld [vmem:[%s586_s1 + $0x10] sm:$0xff]  ;;  %s500_s0 = smov 122   ;;  %v13_v6 = vld [vmem:[%s586_s1 + $0x8] sm:$0xff]  ;;  %v501_v18 = vmov 30  }
   0x5   :  { %437 = vmatmul.msk.f32.vlgmr.msra.gmra.mxu2 %vm35_vm1, %v527_v2  ;;  %441 = vmatmul.msk.f32.vlgmr.msra.gmra.mxu3 %vm35_vm1, %v527_v2  ;;  %v15_v15 = vld [vmem:[%s586_s1 + $0x18] sm:$0xff]  ;;  %vm177_vm2 = vcmask 195584   ;;  %vm400_vm3 = vcmask 1040384   ;;  %vm402_vm4 = vcmask 1042434   ;;  %s502_s1 = smov [#allocation2]   ;;  %s419_s28 = sshll.u32 %s587_s2, 4  ;;  %s420_s28 = int_to_ptr.hbm [resolvable:$true] %s419_s28 }
   0x6   :  { %171 = vrot.lane.b32.xlu0 %v527_v2, %s500_s0  ;;  %175 = vrot.lane.b32.xlu1 %v14_v5, %s500_s0  ;;  %s417_s25 = sshll.u32 %s502_s1, 4  ;;  %vm404_vm5 = vcmask 1041408   ;;  %s418_s25 = int_to_ptr.vmem [resolvable:$true] %s417_s25 }
   0x7   :  { %463 = vset.pattern.permute.xlu1 %v501_v18  ;;  %464 = vset.pattern.permute.xlu2 %v501_v18 }
   0x8   :  { %23 = vperm.xlu2 %464, %v13_v6   ;;  %465 = vset.pattern.permute.xlu0 %v501_v18 }
   0xc   :  { %430 = vmatmul.msk.f32.gmra.mxu0 %vm35_vm1, %v13_v6  ;;  %434 = vmatmul.msk.f32.gmra.mxu1 %vm35_vm1, %v13_v6 }
   0xd   :  { %438 = vmatmul.msk.f32.gmra.mxu2 %vm35_vm1, %v13_v6  ;;  %442 = vmatmul.msk.f32.gmra.mxu3 %vm35_vm1, %v13_v6 }
   0xe   :  { %173 = vrot.lane.b32.xlu0 %v13_v6, %s500_s0  ;;  %28 = vperm.xlu1 %463, %v14_v5  }
  0x10   :  { %18 = vperm.xlu2 %464, %v527_v2  }
  0x14   :  { %431 = vmatmul.msk.f32.gmra.mxu0 %vm35_vm1, %v14_v5  ;;  %435 = vmatmul.msk.f32.gmra.mxu1 %vm35_vm1, %v14_v5 }
  0x15   :  { %439 = vmatmul.msk.f32.gmra.mxu2 %vm35_vm1, %v14_v5  ;;  %443 = vmatmul.msk.f32.gmra.mxu3 %vm35_vm1, %v14_v5 }
  0x16   :  { %305 = vrot.lane.b32.xlu0 %v15_v15, %s500_s0  ;;  %302 = vperm.xlu1 %463, %v15_v15  }
  0x62   :  { %v24_v38 = vpop.permute.xlu2 %23 }
  0x6a   :  { %v19_v44 = vpop.permute.xlu2 %18 }
  0x78   :  { %v172_v24 = vpop.permute.xlu0 %171  ;;  %v176_v35 = vpop.permute.xlu1 %175 }
  0x80   :  { %v174_v34 = vpop.permute.xlu0 %173  ;;  %v29_v43 = vpop.permute.xlu1 %28 }
  0x81   :  { %v72_v7 = vpop.f32.mrf.mxu0  ;;  %v98_v8 = vpop.f32.mrf.mxu1 }
  0x82   :  { %v159_v23 = vmax.f32 %v72_v7, 0.0  ;;  %v160_v25 = vmax.f32 %v98_v8, 0.0 }
  0x88   :  { %v124_v9 = vpop.f32.mrf.mxu2  ;;  %v150_v10 = vpop.f32.mrf.mxu3 }
  0x89   :  { %v75_v11 = vpop.f32.mrf.mxu0  ;;  %v101_v12 = vpop.f32.mrf.mxu1  ;;  %v161_v32 = vmax.f32 %v124_v9, 0.0  ;;  %v162_v33 = vmax.f32 %v150_v10, 0.0 }
  0x8a   :  { %v163_v19 = vmax.f32 %v75_v11, 0.0  ;;  %v164_v20 = vmax.f32 %v101_v12, 0.0  ;;  %v306_v59 = vpop.permute.xlu0 %305 }
  0x90   :  { %v127_v13 = vpop.f32.mrf.mxu2  ;;  %v153_v14 = vpop.f32.mrf.mxu3 }
  0x91   :  { %v78_v16 = vpop.f32.mrf.mxu0  ;;  %v104_v17 = vpop.f32.mrf.mxu1  ;;  %v165_v30 = vmax.f32 %v127_v13, 0.0  ;;  %v166_v31 = vmax.f32 %v153_v14, 0.0 }
  0x92   :  { %v167_v21 = vmax.f32 %v78_v16, 0.0  ;;  %v168_v22 = vmax.f32 %v104_v17, 0.0  ;;  %v303_v13 = vpop.permute.xlu1 %302 }
  0x94   :  { %197 = vmatpush.msrb.mxu0 %v167_v21  ;;  %223 = vmatpush.msrb.mxu1 %v168_v22  ;;  %v407_v22 = vlaneseq }
  0x96   :  { %198 = vmatpush.msrb.mxu0 %v163_v19  ;;  %224 = vmatpush.msrb.mxu1 %v164_v20  ;;  %vm409_vm6 = vcmp.lt.s32.totalorder %v407_v22, 512 }
  0x98   :  { %v130_v26 = vpop.f32.mrf.mxu2  ;;  %v156_v27 = vpop.f32.mrf.mxu3  ;;  %199 = vmatpush.msrb.mxu0 %v159_v23  ;;  %225 = vmatpush.msrb.mxu1 %v160_v25 }
  0x99   :  { %v169_v28 = vmax.f32 %v130_v26, 0.0  ;;  %v170_v29 = vmax.f32 %v156_v27, 0.0  ;;  %444 = vmatmul.msk.f32.vlgmr.msrb.gmra.mxu0 %vm177_vm2, %v172_v24  ;;  %447 = vmatmul.msk.f32.vlgmr.msrb.gmra.mxu1 %vm177_vm2, %v172_v24 }
  0x9b   :  { %249 = vmatpush.msrb.mxu2 %v169_v28  ;;  %275 = vmatpush.msrb.mxu3 %v170_v29 }
  0x9d   :  { %250 = vmatpush.msrb.mxu2 %v165_v30  ;;  %276 = vmatpush.msrb.mxu3 %v166_v31 }
  0x9f   :  { %251 = vmatpush.msrb.mxu2 %v161_v32  ;;  %277 = vmatpush.msrb.mxu3 %v162_v33 }
  0xa0   :  { %450 = vmatmul.msk.f32.vlgmr.msrb.gmra.mxu2 %vm177_vm2, %v172_v24  ;;  %453 = vmatmul.msk.f32.vlgmr.msrb.gmra.mxu3 %vm177_vm2, %v172_v24 }
  0xa1   :  { %445 = vmatmul.msk.f32.gmra.mxu0 %vm177_vm2, %v174_v34  ;;  %448 = vmatmul.msk.f32.gmra.mxu1 %vm177_vm2, %v174_v34 }
  0xa8   :  { %451 = vmatmul.msk.f32.gmra.mxu2 %vm177_vm2, %v174_v34  ;;  %454 = vmatmul.msk.f32.gmra.mxu3 %vm177_vm2, %v174_v34 }
  0xa9   :  { %446 = vmatmul.msk.f32.gmra.mxu0 %vm177_vm2, %v176_v35  ;;  %449 = vmatmul.msk.f32.gmra.mxu1 %vm177_vm2, %v176_v35 }
  0xb0   :  { %452 = vmatmul.msk.f32.gmra.mxu2 %vm177_vm2, %v176_v35  ;;  %455 = vmatmul.msk.f32.gmra.mxu3 %vm177_vm2, %v176_v35 }
 0x116   :  { %v201_v36 = vpop.f32.mrf.mxu0  ;;  %v227_v37 = vpop.f32.mrf.mxu1 }
 0x117   :  { %v202_v51 = vadd.f32 %v201_v36, %v19_v44  ;;  %v228_v52 = vadd.f32 %v227_v37, %v19_v44 }
 0x119   :  { %v288_v60 = vmax.f32 %v202_v51, 0.0  ;;  %v289_v61 = vmax.f32 %v228_v52, 0.0 }
 0x11e   :  { %v204_v39 = vpop.f32.mrf.mxu0  ;;  %v230_v40 = vpop.f32.mrf.mxu1 }
 0x11f   :  { %v205_v47 = vadd.f32 %v204_v39, %v24_v38  ;;  %v231_v48 = vadd.f32 %v230_v40, %v24_v38 }
 0x121   :  { %v292_v55 = vmax.f32 %v205_v47, 0.0  ;;  %v293_v56 = vmax.f32 %v231_v48, 0.0 }
 0x123   :  { %v253_v41 = vpop.f32.mrf.mxu2  ;;  %v279_v42 = vpop.f32.mrf.mxu3 }
 0x124   :  { %v254_v4 = vadd.f32 %v253_v41, %v19_v44  ;;  %v280_v5 = vadd.f32 %v279_v42, %v19_v44 }
 0x126   :  { %v207_v45 = vpop.f32.mrf.mxu0  ;;  %v233_v46 = vpop.f32.mrf.mxu1  ;;  %v290_v10 = vmax.f32 %v254_v4, 0.0  ;;  %v291_v11 = vmax.f32 %v280_v5, 0.0 }
 0x127   :  { %v208_v49 = vadd.f32 %v207_v45, %v29_v43  ;;  %v234_v50 = vadd.f32 %v233_v46, %v29_v43 }
 0x129   :  { %v296_v53 = vmax.f32 %v208_v49, 0.0  ;;  %v297_v54 = vmax.f32 %v234_v50, 0.0 }
 0x12b   :  { %v256_v57 = vpop.f32.mrf.mxu2  ;;  %v282_v58 = vpop.f32.mrf.mxu3  ;;  %322 = vmatpush.msra.mxu0 %v296_v53  ;;  %342 = vmatpush.msra.mxu1 %v297_v54 }
 0x12c   :  { %v257_v0 = vadd.f32 %v256_v57, %v24_v38  ;;  %v283_v1 = vadd.f32 %v282_v58, %v24_v38 }
 0x12d   :  { %323 = vmatpush.msra.mxu0 %v292_v55  ;;  %343 = vmatpush.msra.mxu1 %v293_v56 }
 0x12e   :  { %v294_v8 = vmax.f32 %v257_v0, 0.0  ;;  %v295_v9 = vmax.f32 %v283_v1, 0.0 }
 0x12f   :  { %324 = vmatpush.msra.mxu0 %v288_v60  ;;  %344 = vmatpush.msra.mxu1 %v289_v61 }
 0x130   :  { %456 = vmatmul.msk.f32.vlgmr.msra.gmra.mxu0 %vm177_vm2, %v306_v59  ;;  %457 = vmatmul.msk.f32.vlgmr.msra.gmra.mxu1 %vm177_vm2, %v306_v59 }
 0x133   :  { %v259_v62 = vpop.f32.mrf.mxu2  ;;  %v285_v63 = vpop.f32.mrf.mxu3 }
 0x134   :  { %v260_v2 = vadd.f32 %v259_v62, %v29_v43  ;;  %v286_v3 = vadd.f32 %v285_v63, %v29_v43 }
 0x136   :  { %v298_v6 = vmax.f32 %v260_v2, 0.0  ;;  %v299_v7 = vmax.f32 %v286_v3, 0.0 }
 0x138   :  { %362 = vmatpush.msra.mxu2 %v298_v6  ;;  %382 = vmatpush.msra.mxu3 %v299_v7 }
 0x13a   :  { %363 = vmatpush.msra.mxu2 %v294_v8  ;;  %383 = vmatpush.msra.mxu3 %v295_v9 }
 0x13c   :  { %364 = vmatpush.msra.mxu2 %v290_v10  ;;  %384 = vmatpush.msra.mxu3 %v291_v11 }
 0x13d   :  { %458 = vmatmul.msk.f32.vlgmr.msra.gmra.mxu2 %vm177_vm2, %v306_v59  ;;  %459 = vmatmul.msk.f32.vlgmr.msra.gmra.mxu3 %vm177_vm2, %v306_v59 }
 0x1ad   :  { %v346_v12 = vpop.f32.mrf.mxu1  ;;  %v326_v15 = vpop.f32.mrf.mxu0 }
 0x1ae   :  { %v347_v14 = vadd.f32 %v346_v12, %v303_v13  ;;  %v327_v20 = vadd.f32 %v326_v15, %v303_v13 }
 0x1b0   :  { %466 = vtanh.f32 %v347_v14 }
 0x1b6   :  { %v467_v21 = vpop.eup %466 }
 0x1b7   :  { %v397_v24 = vrot.slane %v467_v21, 7 }
 0x1c0   :  { %v366_v16 = vpop.f32.mrf.mxu2  ;;  %v386_v17 = vpop.f32.mrf.mxu3 }
 0x1c1   :  { %v367_v18 = vadd.f32 %v366_v16, %v303_v13  ;;  %v387_v19 = vadd.f32 %v386_v17, %v303_v13 }
 0x1c3   :  { %468 = vtanh.f32 %v367_v18 }
 0x1c4   :  { %470 = vtanh.f32 %v387_v19 }
 0x1c5   :  { %472 = vtanh.f32 %v327_v20 }
 0x1c9   :  { %v469_v23 = vpop.eup %468 }
 0x1ca   :  { %v471_v25 = vpop.eup %470  ;;  %v398_v26 = vrot.slane %v469_v23, 6 }
 0x1cb   :  { %v399_v27 = vrot.slane %v471_v25, 5  ;;  %v473_v28 = vpop.eup %472 }
 0x1cc   :  { %v401_v29 = vsel %vm400_vm3, %v473_v28, %v397_v24 }
 0x1cd   :  { %v403_v30 = vsel %vm402_vm4, %v398_v26, %v399_v27 }
 0x1ce   :  { %v405_v31 = vsel %vm404_vm5, %v401_v29, %v403_v30 }
 0x1cf   :  { %411 = vst.msk [vmem:[#allocation2] sm:$0xf] %vm409_vm6, %v405_v31 }
 0x1d0   :  { %422 = dma.vmem_to_hbm [thread:$0]  %s418_s25, 64, %s420_s28, [#allocation3]  }
 0x1d1   :  { %498 = dma.done.wait [#allocation3], 64  }
 0x1d2   :  { %499 = vsyncadd [#allocation3], 4294967232 }
 0x1d3   :  { %427 = vsyncpa [#allocation3], 1 }

</bundles_post_ra>
